<compile_context>
chip_gen: v7x
topology: tpu7x:2x2x1
jax: 0.10.0
libtpu: 0.0.40
codegen_flags: <defaults>
</compile_context>

<pallas_src>
import functools

import jax
import jax.numpy as jnp
from jax.experimental import pallas as pl
from jax.experimental.pallas import tpu as pltpu


def _round_up(x, m):
    return ((x + m - 1) // m) * m


def _policy_mlp_kernel(x_ref, w1_ref, b1_ref, w2_ref, b2_ref, w3_ref, b3_ref,
                       o_ref, *, compute_dtype):
    # x streams from HBM in its native dtype (f32); cast to the MXU operand
    # dtype on the VPU here.  Weights arrive pre-cast (prepare_params).
    x = x_ref[...].astype(compute_dtype)                            # (TB, D)

    h1 = jnp.dot(x, w1_ref[...], preferred_element_type=jnp.float32)
    h1 = jnp.maximum(h1 + b1_ref[...], 0.0)                         # (TB, WP) f32

    h2 = jnp.dot(h1.astype(compute_dtype), w2_ref[...],
                 preferred_element_type=jnp.float32)
    h2 = jnp.maximum(h2 + b2_ref[...], 0.0)                         # (TB, WP) f32

    logits = jnp.dot(h2.astype(compute_dtype), w3_ref[...],
                     preferred_element_type=jnp.float32)
    logits = logits + b3_ref[...]                                   # (TB, A)

    m = jnp.max(logits, axis=1, keepdims=True)
    e = jnp.exp(logits - m)
    s = jnp.sum(e, axis=1, keepdims=True)
    o_ref[...] = e / s          # exact softmax; negligible vs. HBM traffic


def prepare_params(params, *, use_bf16=True, lane=128):
    """Pad hidden width to a full 128-lane vreg and cast MXU operands once.

    Call once at init / whenever params change; reuse the result every step.
    Zero-padding is numerically exact (padded hidden units are identically 0
    through ReLU and contribute nothing to the next layer).
    """
    compute_dtype = jnp.bfloat16 if use_bf16 else jnp.float32
    w1, b1 = params["w1"], params["b1"]
    w2, b2 = params["w2"], params["b2"]
    w3, b3 = params["w3"], params["b3"]
    d, width = w1.shape
    n_actions = w3.shape[1]
    wp = _round_up(width, lane)

    w1p = jnp.zeros((d, wp), compute_dtype).at[:, :width].set(
        w1.astype(compute_dtype))
    b1p = jnp.zeros((1, wp), jnp.float32).at[:, :width].set(
        b1.astype(jnp.float32).reshape(1, width))
    w2p = jnp.zeros((wp, wp), compute_dtype).at[:width, :width].set(
        w2.astype(compute_dtype))
    b2p = jnp.zeros((1, wp), jnp.float32).at[:, :width].set(
        b2.astype(jnp.float32).reshape(1, width))
    w3p = jnp.zeros((wp, n_actions), compute_dtype).at[:width, :].set(
        w3.astype(compute_dtype))
    b3f = b3.astype(jnp.float32).reshape(1, n_actions)

    return {
        "w1": w1p, "b1": b1p, "w2": w2p, "b2": b2p, "w3": w3p, "b3": b3f,
        "compute_dtype": compute_dtype,
    }


def policy_mlp_forward(x, prepared, *, tile_b=1024):
    """x: (B, C, H, W) float32; prepared: output of prepare_params()."""
    b = x.shape[0]
    x_flat = x.reshape(b, -1)                       # flatten(1); metadata-only
    d = x_flat.shape[1]

    w1, b1 = prepared["w1"], prepared["b1"]
    w2, b2 = prepared["w2"], prepared["b2"]
    w3, b3 = prepared["w3"], prepared["b3"]
    compute_dtype = prepared["compute_dtype"]
    wp = w1.shape[1]
    n_actions = w3.shape[1]

    # Batch tile: big enough to amortize per-step overhead, small enough that
    # the "parallel" batch axis has >=2 steps (v7x 2-TC sharding) when B does.
    tb = max(8, min(tile_b, _round_up(pl.cdiv(b, 2), 8)))
    grid = (pl.cdiv(b, tb),)                        # no host-side padding

    kernel = functools.partial(_policy_mlp_kernel, compute_dtype=compute_dtype)

    out = pl.pallas_call(
        kernel,
        out_shape=jax.ShapeDtypeStruct((b, n_actions), jnp.float32),
        grid_spec=pltpu.PrefetchScalarGridSpec(
            num_scalar_prefetch=0,
            grid=grid,
            in_specs=[
                pl.BlockSpec((tb, d), lambda i: (i, 0)),           # x tile (f32)
                pl.BlockSpec((d, wp), lambda i: (0, 0)),           # W1 resident
                pl.BlockSpec((1, wp), lambda i: (0, 0)),           # b1 resident
                pl.BlockSpec((wp, wp), lambda i: (0, 0)),          # W2 resident
                pl.BlockSpec((1, wp), lambda i: (0, 0)),           # b2 resident
                pl.BlockSpec((wp, n_actions), lambda i: (0, 0)),   # W3 resident
                pl.BlockSpec((1, n_actions), lambda i: (0, 0)),    # b3 resident
            ],
            # Narrow f32 output: only the real action columns hit HBM.
            out_specs=pl.BlockSpec((tb, n_actions), lambda i: (i, 0)),
        ),
        compiler_params=pltpu.CompilerParams(
            dimension_semantics=("parallel",),
        ),
    )(x_flat, w1, b1, w2, b2, w3, b3)

    return out


def init_params(key, input_dim, n_actions, width=64):
    """Deterministic synthetic parameter init (Kaiming-uniform-ish)."""
    ks = jax.random.split(key, 6)

    def lin(kw, kb, fan_in, fan_out):
        bound = 1.0 / jnp.sqrt(fan_in)
        # stored as (in, out) so kernel computes x @ W + b
        w = jax.random.uniform(kw, (fan_in, fan_out), jnp.float32, -bound, bound)
        bias = jax.random.uniform(kb, (1, fan_out), jnp.float32, -bound, bound)
        return w, bias

    w1, b1 = lin(ks[0], ks[1], input_dim, width)
    w2, b2 = lin(ks[2], ks[3], width, width)
    w3, b3 = lin(ks[4], ks[5], width, n_actions)
    return {"w1": w1, "b1": b1, "w2": w2, "b2": b2, "w3": w3, "b3": b3}


def _reference_f32(x, params):
    xf = x.reshape(x.shape[0], -1)
    h = jnp.maximum(xf @ params["w1"] + params["b1"], 0.0)
    h = jnp.maximum(h @ params["w2"] + params["b2"], 0.0)
    return jax.nn.softmax(h @ params["w3"] + params["b3"], axis=1)


def _reference_mixed(x, params, compute_dtype=jnp.bfloat16):
    """Same bf16-operand / f32-accumulate math as the kernel, in plain JAX."""
    xf = x.reshape(x.shape[0], -1).astype(compute_dtype)
    h = jnp.dot(xf, params["w1"].astype(compute_dtype),
                preferred_element_type=jnp.float32) + params["b1"]
    h = jnp.maximum(h, 0.0)
    h = jnp.dot(h.astype(compute_dtype), params["w2"].astype(compute_dtype),
                preferred_element_type=jnp.float32) + params["b2"]
    h = jnp.maximum(h, 0.0)
    logits = jnp.dot(h.astype(compute_dtype), params["w3"].astype(compute_dtype),
                     preferred_element_type=jnp.float32) + params["b3"]
    return jax.nn.softmax(logits, axis=1)


if __name__ == "__main__":
    key = jax.random.PRNGKey(0)
    k_x, k_p = jax.random.split(key)

    # Small shapes consistent with the module: input_shape=(4,4,4) -> D=64,
    # width=64 hidden, n_actions=8, batch=2.
    B, C, H, W = 2, 4, 4, 4
    D = C * H * W
    N_ACTIONS = 8
    WIDTH = 64

    x = jax.random.normal(k_x, (B, C, H, W), dtype=jnp.float32)
    params = init_params(k_p, D, N_ACTIONS, WIDTH)
    prepared = prepare_params(params)           # pad/cast weights ONCE

    out = policy_mlp_forward(x, prepared)
    out = jax.block_until_ready(out)

    ref_mixed = _reference_mixed(x, params)     # matches kernel's bf16/f32 math
    ref_f32 = _reference_f32(x, params)         # original full-f32 semantics

    assert out.shape == (B, N_ACTIONS)
    # Exact softmax normalization -> row sums are 1 to f32 precision.
    assert jnp.allclose(jnp.sum(out, axis=1), 1.0, atol=1e-5)
    assert jnp.allclose(out, ref_mixed, atol=2e-3, rtol=2e-3)
    assert jnp.allclose(out, ref_f32, atol=3e-2, rtol=3e-2)

    # TODO(synk): select_action's Categorical sampling / log_prob gather lives
    # outside forward(); fusing it into the kernel (per-row scalar output)
    # would cut the remaining writeback further.

    print("KERNEL_OK")
</pallas_src>

<mosaic_0001>
module attributes {stable_mosaic.version = 11 : i64} {
  func.func @_policy_mlp_kernel(%arg0: i32, %arg1: memref<8x64xf32, #tpu.memory_space<vmem>>, %arg2: memref<64x128xbf16, #tpu.memory_space<vmem>>, %arg3: memref<1x128xf32, #tpu.memory_space<vmem>>, %arg4: memref<128x128xbf16, #tpu.memory_space<vmem>>, %arg5: memref<1x128xf32, #tpu.memory_space<vmem>>, %arg6: memref<128x8xbf16, #tpu.memory_space<vmem>>, %arg7: memref<1x8xf32, #tpu.memory_space<vmem>>, %arg8: memref<8x8xf32, #tpu.memory_space<vmem>>) attributes {dimension_semantics = [#tpu.dimension_semantics<parallel>], iteration_bounds = array<i64: 1>, scalar_prefetch = 0 : i64, scratch_operands = 0 : i64, tpu.core_type = #tpu.core_type<tc>, window_params = [{transform_indices = @transform_0, window_bounds = array<i64: 8, 64>}, {pipeline_mode = #tpu.pipeline_mode<synchronous>, transform_indices = @transform_1, window_bounds = array<i64: 64, 128>}, {pipeline_mode = #tpu.pipeline_mode<synchronous>, transform_indices = @transform_2, window_bounds = array<i64: 1, 128>}, {pipeline_mode = #tpu.pipeline_mode<synchronous>, transform_indices = @transform_3, window_bounds = array<i64: 128, 128>}, {pipeline_mode = #tpu.pipeline_mode<synchronous>, transform_indices = @transform_4, window_bounds = array<i64: 1, 128>}, {pipeline_mode = #tpu.pipeline_mode<synchronous>, transform_indices = @transform_5, window_bounds = array<i64: 128, 8>}, {pipeline_mode = #tpu.pipeline_mode<synchronous>, transform_indices = @transform_6, window_bounds = array<i64: 1, 8>}, {transform_indices = @transform_7, window_bounds = array<i64: 8, 8>}]} {
    %c0 = arith.constant 0 : index
    %c0_0 = arith.constant 0 : index
    %0 = vector.load %arg1[%c0, %c0_0] : memref<8x64xf32, #tpu.memory_space<vmem>>, vector<8x64xf32>
    %1 = arith.truncf %0 : vector<8x64xf32> to vector<8x64xbf16>
    %c0_1 = arith.constant 0 : index
    %c0_2 = arith.constant 0 : index
    %2 = vector.load %arg2[%c0_1, %c0_2] : memref<64x128xbf16, #tpu.memory_space<vmem>>, vector<64x128xbf16>
    %cst = arith.constant dense<0.000000e+00> : vector<8x128xf32>
    %3 = tpu.matmul %1, %2, %cst {dimension_numbers = #tpu.dot_dimension_numbers<[1], [0], [0], [1], [0, 0, 1, 1], [], []>} : vector<8x64xbf16>, vector<64x128xbf16>, vector<8x128xf32> -> vector<8x128xf32>
    %c0_3 = arith.constant 0 : index
    %c0_4 = arith.constant 0 : index
    %4 = vector.load %arg3[%c0_3, %c0_4] : memref<1x128xf32, #tpu.memory_space<vmem>>, vector<1x128xf32>
    %5 = vector.broadcast %4 : vector<1x128xf32> to vector<8x128xf32>
    %6 = arith.addf %3, %5 : vector<8x128xf32>
    %cst_5 = arith.constant 0.000000e+00 : f32
    %7 = vector.broadcast %cst_5 : f32 to vector<8x128xf32>
    %8 = arith.maximumf %6, %7 : vector<8x128xf32>
    %9 = arith.truncf %8 : vector<8x128xf32> to vector<8x128xbf16>
    %c0_6 = arith.constant 0 : index
    %c0_7 = arith.constant 0 : index
    %10 = vector.load %arg4[%c0_6, %c0_7] : memref<128x128xbf16, #tpu.memory_space<vmem>>, vector<128x128xbf16>
    %cst_8 = arith.constant dense<0.000000e+00> : vector<8x128xf32>
    %11 = tpu.matmul %9, %10, %cst_8 {dimension_numbers = #tpu.dot_dimension_numbers<[1], [0], [0], [1], [0, 0, 1, 1], [], []>} : vector<8x128xbf16>, vector<128x128xbf16>, vector<8x128xf32> -> vector<8x128xf32>
    %c0_9 = arith.constant 0 : index
    %c0_10 = arith.constant 0 : index
    %12 = vector.load %arg5[%c0_9, %c0_10] : memref<1x128xf32, #tpu.memory_space<vmem>>, vector<1x128xf32>
    %13 = vector.broadcast %12 : vector<1x128xf32> to vector<8x128xf32>
    %14 = arith.addf %11, %13 : vector<8x128xf32>
    %cst_11 = arith.constant 0.000000e+00 : f32
    %15 = vector.broadcast %cst_11 : f32 to vector<8x128xf32>
    %16 = arith.maximumf %14, %15 : vector<8x128xf32>
    %17 = arith.truncf %16 : vector<8x128xf32> to vector<8x128xbf16>
    %c0_12 = arith.constant 0 : index
    %c0_13 = arith.constant 0 : index
    %18 = vector.load %arg6[%c0_12, %c0_13] : memref<128x8xbf16, #tpu.memory_space<vmem>>, vector<128x8xbf16>
    %cst_14 = arith.constant dense<0.000000e+00> : vector<8x8xf32>
    %19 = tpu.matmul %17, %18, %cst_14 {dimension_numbers = #tpu.dot_dimension_numbers<[1], [0], [0], [1], [0, 0, 1, 1], [], []>} : vector<8x128xbf16>, vector<128x8xbf16>, vector<8x8xf32> -> vector<8x8xf32>
    %c0_15 = arith.constant 0 : index
    %c0_16 = arith.constant 0 : index
    %20 = vector.load %arg7[%c0_15, %c0_16] : memref<1x8xf32, #tpu.memory_space<vmem>>, vector<1x8xf32>
    %21 = vector.broadcast %20 : vector<1x8xf32> to vector<8x8xf32>
    %22 = arith.addf %19, %21 : vector<8x8xf32>
    %cst_17 = arith.constant dense<0xFF800000> : vector<8xf32>
    %23 = vector.multi_reduction <maximumf>, %22, %cst_17 [1] : vector<8x8xf32> to vector<8xf32>
    %24 = vector.shape_cast %23 : vector<8xf32> to vector<8x1xf32>
    %25 = vector.broadcast %24 : vector<8x1xf32> to vector<8x8xf32>
    %26 = arith.subf %22, %25 : vector<8x8xf32>
    %27 = math.exp %26 : vector<8x8xf32>
    %cst_18 = arith.constant dense<0.000000e+00> : vector<8xf32>
    %28 = vector.multi_reduction <add>, %27, %cst_18 [1] : vector<8x8xf32> to vector<8xf32>
    %29 = vector.shape_cast %28 : vector<8xf32> to vector<8x1xf32>
    %30 = vector.broadcast %29 : vector<8x1xf32> to vector<8x8xf32>
    %31 = arith.divf %27, %30 : vector<8x8xf32>
    %c0_19 = arith.constant 0 : index
    %c0_20 = arith.constant 0 : index
    %32 = vector.load %arg8[%c0_19, %c0_20] : memref<8x8xf32, #tpu.memory_space<vmem>>, vector<8x8xf32>
    tpu.vector_store %arg8[%c0_19, %c0_20], %31 {strides = array<i32>} : memref<8x8xf32, #tpu.memory_space<vmem>>, vector<8x8xf32>,
    return
  }
  func.func @transform_0(%arg0: i32) -> (i32, i32) {
    %c0_i32 = arith.constant 0 : i32
    %c0_i32_0 = arith.constant 0 : i32
    return %arg0, %c0_i32 : i32, i32
  }
  func.func @transform_1(%arg0: i32) -> (i32, i32) {
    %c0_i32 = arith.constant 0 : i32
    %c0_i32_0 = arith.constant 0 : i32
    %c0_i32_1 = arith.constant 0 : i32
    return %c0_i32, %c0_i32_0 : i32, i32
  }
  func.func @transform_2(%arg0: i32) -> (i32, i32) {
    %c0_i32 = arith.constant 0 : i32
    %c0_i32_0 = arith.constant 0 : i32
    %c0_i32_1 = arith.constant 0 : i32
    return %c0_i32, %c0_i32_0 : i32, i32
  }
  func.func @transform_3(%arg0: i32) -> (i32, i32) {
    %c0_i32 = arith.constant 0 : i32
    %c0_i32_0 = arith.constant 0 : i32
    %c0_i32_1 = arith.constant 0 : i32
    return %c0_i32, %c0_i32_0 : i32, i32
  }
  func.func @transform_4(%arg0: i32) -> (i32, i32) {
    %c0_i32 = arith.constant 0 : i32
    %c0_i32_0 = arith.constant 0 : i32
    %c0_i32_1 = arith.constant 0 : i32
    return %c0_i32, %c0_i32_0 : i32, i32
  }
  func.func @transform_5(%arg0: i32) -> (i32, i32) {
    %c0_i32 = arith.constant 0 : i32
    %c0_i32_0 = arith.constant 0 : i32
    %c0_i32_1 = arith.constant 0 : i32
    return %c0_i32, %c0_i32_0 : i32, i32
  }
  func.func @transform_6(%arg0: i32) -> (i32, i32) {
    %c0_i32 = arith.constant 0 : i32
    %c0_i32_0 = arith.constant 0 : i32
    %c0_i32_1 = arith.constant 0 : i32
    return %c0_i32, %c0_i32_0 : i32, i32
  }
  func.func @transform_7(%arg0: i32) -> (i32, i32) {
    %c0_i32 = arith.constant 0 : i32
    %c0_i32_0 = arith.constant 0 : i32
    return %arg0, %c0_i32 : i32, i32
  }
}

</mosaic_0001>

<bundles_post_ra>
// kernel: tpu_custom_call.1
= control target key start
LH: loop header
LB: loop body
LE: loop exit
PB: predicated region body
PF: predicated region fallthrough
CT: control target
= control target key end

     0   :  { %12 = vsyncpa [#allocation3], 0  ;;  %s723_s0 = inlined_call_operand.vmem [shape: f32[2,64], index: 0, kind: input, shape index: {}]   ;;  %s724_s1 = inlined_call_operand.hbm [shape: bf16[64,128], index: 1, kind: input, shape index: {}]   ;;  %s725_s2 = inlined_call_operand.vmem [shape: f32[1,128], index: 2, kind: input, shape index: {}]   ;;  %s726_s3 = inlined_call_operand.vmem [shape: bf16[128,128], index: 3, kind: input, shape index: {}]   ;;  %s727_s4 = inlined_call_operand.vmem [shape: f32[1,128], index: 4, kind: input, shape index: {}]   ;;  %s728_s5 = inlined_call_operand.vmem [shape: bf16[128,8], index: 5, kind: input, shape index: {}]   ;;  %s729_s6 = inlined_call_operand.vmem [shape: f32[1,8], index: 6, kind: input, shape index: {}]   ;;  %s730_s7 = inlined_call_operand.hbm [shape: f32[2,8], index: 7, kind: output, shape index: {}]  }
   0x1   :  { %13 = vsyncpa [#allocation4], 0  ;;  %s562_s24 = smov [#allocation2]   ;;  %s514_s28 = scalar_lea.hbm %s724_s1, 512 }
   0x2   :  { %s21_s25 = sshll.u32 %s562_s24, 4  ;;  %p515_p0 = scmp.ne.s32.totalorder %s724_s1, %s514_s28  ;;  %s22_s25 = int_to_ptr.vmem [resolvable:$true] %s21_s25 }
   0x3   :  { %p518_p1 = scmp.lt.u32.totalorder %s514_s28, %s724_s1 }
   0x5   :  { %p520_p2 = pnand %p518_p1, %p515_p0 }
   0x7   :  { %523 = shalt.err (!%p520_p2)
}
   0x8   :  { %s524_s10 = scalar_lea.vmem %s22_s25, 512  ;;  %p529_p4 = scmp.lt.s32.totalorder %s22_s25, %s22_s25 }
   0x9   :  { %p525_p3 = scmp.ne.s32.totalorder %s22_s25, %s524_s10  ;;  %p530_p5 = scmp.lt.s32.totalorder %s524_s10, %s524_s10 }
   0xb   :  { %p531_p6 = por %p530_p5, %p529_p4 }
   0xd   :  { %p532_p7 = pnand %p531_p6, %p525_p3 }
   0xf   :  { %535 = shalt.err (!%p532_p7)
}
  0x10   :  { %s563_s11 = smov 64   ;;  %s564_s12 = smov 4  }
  0x11   :  { %27 = dma.hbm_to_vmem [thread:$0]  %s724_s1, 512, %s22_s25, [#allocation3], %s563_s11, %s563_s11, %s564_s12  }
  0x12   :  { %558 = dma.done.wait [#allocation3], 512  }
  0x13   :  { %559 = vsyncadd [#allocation3], 4294966784  ;;  %v565_v0 = vmov 0.0   ;;  %vm566_vm0 = vmmov 0   ;;  %v490_v1 = vld [vmem:[#allocation2] sm:$0xff]   ;;  %v491_v2 = vld [vmem:[#allocation2 + $0x8] sm:$0xff]  }
  0x14   :  { %430 = vmatprep.subr.bf16.mxu0 %v565_v0  ;;  %438 = vmatprep.mubr.msk.bf16.mxu0 %vm566_vm0, %v565_v0  ;;  %v494_v3 = vld [vmem:[%s726_s3] sm:$0xff]   ;;  %v492_v4 = vld [vmem:[#allocation2 + $0x10] sm:$0xff]   ;;  %v495_v5 = vld [vmem:[%s726_s3 + $0x8] sm:$0xff]   ;;  %vm83_vm1 = vcmask 523264   ;;  %vm353_vm2 = vcmask 64512  }
  0x15   :  { %442 = vmatprep.subr.bf16.mxu1 %v565_v0  ;;  %458 = vmatprep.mubr.msk.bf16.mxu1 %vm566_vm0, %v565_v0  ;;  %v493_v6 = vld [vmem:[#allocation2 + $0x18] sm:$0xff]   ;;  %v42_v7 = vld [vmem:[%s723_s0] sm:$0xff]  ;;  %v496_v8 = vld [vmem:[%s726_s3 + $0x10] sm:$0xff]  }
  0x16   :  { %431 = vmatpush3.bf16.msra.mxu0 %v490_v1  ;;  %443 = vmatpush3.bf16.msra.mxu1 %v494_v3  ;;  %v43_v9 = vpack.c.bf16 %v42_v7, %v42_v7  ;;  %v497_v10 = vld [vmem:[%s726_s3 + $0x18] sm:$0xff]   ;;  %v498_v11 = vld [vmem:[%s726_s3 + $0x20] sm:$0xff]   ;;  %v499_v12 = vld [vmem:[%s726_s3 + $0x28] sm:$0xff]  }
  0x17   :  { %432 = vmatprep.subr.bf16.mxu0 %v565_v0  ;;  %444 = vmatprep.subr.bf16.mxu1 %v565_v0  ;;  %v500_v13 = vld [vmem:[%s726_s3 + $0x30] sm:$0xff]   ;;  %v501_v14 = vld [vmem:[%s726_s3 + $0x38] sm:$0xff]   ;;  %v502_v15 = vld [vmem:[%s728_s5] sm:$0xff]  }
  0x18   :  { %v503_v16 = vld [vmem:[%s728_s5 + $0x8] sm:$0xff]   ;;  %v504_v17 = vld [vmem:[%s728_s5 + $0x10] sm:$0xff]   ;;  %v505_v18 = vld [vmem:[%s728_s5 + $0x18] sm:$0xff]  }
  0x19   :  { %v506_v19 = vld [vmem:[%s728_s5 + $0x20] sm:$0xff]   ;;  %v507_v20 = vld [vmem:[%s728_s5 + $0x28] sm:$0xff]   ;;  %v508_v29 = vld [vmem:[%s728_s5 + $0x30] sm:$0xff]  }
  0x1a   :  { %433 = vmatpush3.bf16.msra.mxu0 %v491_v2  ;;  %445 = vmatpush3.bf16.msra.mxu1 %v495_v5  ;;  %v383_v21 = vld [vmem:[%s725_s2] ss:$0 sm:$0xff]  ;;  %v509_v30 = vld [vmem:[%s728_s5 + $0x38] sm:$0xff]  }
  0x1b   :  { %434 = vmatprep.subr.bf16.mxu0 %v565_v0  ;;  %446 = vmatprep.subr.bf16.mxu1 %v565_v0  ;;  %v389_v31 = vld [vmem:[%s727_s4] ss:$0 sm:$0xff] }
  0x1c   :  { %v398_v39 = vld [vmem:[%s729_s6] ss:$0 sm:$0xff] }
  0x1e   :  { %435 = vmatpush3.bf16.msra.mxu0 %v492_v4  ;;  %447 = vmatpush3.bf16.msra.mxu1 %v496_v8 }
  0x1f   :  { %436 = vmatprep.subr.bf16.mxu0 %v565_v0  ;;  %448 = vmatprep.subr.bf16.mxu1 %v565_v0 }
  0x22   :  { %437 = vmatpush3.bf16.msra.mxu0 %v493_v6  ;;  %449 = vmatpush3.bf16.msra.mxu1 %v497_v10 }
  0x23   :  { %462 = vmatprep.subr.bf16.mxu0 %v565_v0  ;;  %450 = vmatprep.subr.bf16.mxu1 %v565_v0 }
  0x25   :  { %439 = vmatmul.mubr.msk.bf16.vlgmr.msra.gmra.mrb[0].mxu0 %vm83_vm1, %v43_v9 }
  0x26   :  { %478 = vmatprep.mubr.msk.bf16.mxu0 %vm566_vm0, %v565_v0  ;;  %451 = vmatpush3.bf16.msra.mxu1 %v498_v11 }
  0x27   :  { %452 = vmatprep.subr.bf16.mxu1 %v565_v0  ;;  %463 = vmatpush3.bf16.msra.mxu0 %v502_v15 }
  0x28   :  { %464 = vmatprep.subr.bf16.mxu0 %v565_v0 }
  0x2a   :  { %453 = vmatpush3.bf16.msra.mxu1 %v499_v12 }
  0x2b   :  { %454 = vmatprep.subr.bf16.mxu1 %v565_v0  ;;  %465 = vmatpush3.bf16.msra.mxu0 %v503_v16 }
  0x2c   :  { %466 = vmatprep.subr.bf16.mxu0 %v565_v0 }
  0x2e   :  { %455 = vmatpush3.bf16.msra.mxu1 %v500_v13 }
  0x2f   :  { %456 = vmatprep.subr.bf16.mxu1 %v565_v0  ;;  %467 = vmatpush3.bf16.msra.mxu0 %v504_v17 }
  0x30   :  { %468 = vmatprep.subr.bf16.mxu0 %v565_v0 }
  0x32   :  { %457 = vmatpush3.bf16.msra.mxu1 %v501_v14 }
  0x33   :  { %469 = vmatpush3.bf16.msra.mxu0 %v505_v18 }
  0x34   :  { %470 = vmatprep.subr.bf16.mxu0 %v565_v0 }
  0x37   :  { %471 = vmatpush3.bf16.msra.mxu0 %v506_v19 }
  0x38   :  { %472 = vmatprep.subr.bf16.mxu0 %v565_v0 }
  0x3b   :  { %473 = vmatpush3.bf16.msra.mxu0 %v507_v20 }
  0x3c   :  { %474 = vmatprep.subr.bf16.mxu0 %v565_v0 }
  0x3f   :  { %475 = vmatpush3.bf16.msra.mxu0 %v508_v29 }
  0x40   :  { %476 = vmatprep.subr.bf16.mxu0 %v565_v0 }
  0x43   :  { %477 = vmatpush3.bf16.msra.mxu0 %v509_v30 }
  0xf8   :  { %v121_v22 = vpop.f32.mrb[0].mxu0 }
  0xf9   :  { %v122_v23 = vadd.f32 %v383_v21, %v121_v22  ;;  %v440_v24 = vpop.f32.mrb[1].mxu0 }
  0xfa   :  { %v124_v25 = vpop.f32.mrb[2].mxu0 }
  0xfb   :  { %v127_v26 = vmax.f32 %v122_v23, 0.0  ;;  %v441_v27 = vpop.f32.mrb[3].mxu0 }
  0xfd   :  { %v128_v28 = vpack.c.bf16 %v127_v26, %v127_v26 }
  0xff   :  { %459 = vmatmul.mubr.bf16.vlgmr.msra.gmra.mrb[0].mxu1 %v128_v28 }
 0x1d2   :  { %v234_v32 = vpop.f32.mrb[0].mxu1 }
 0x1d3   :  { %v235_v33 = vadd.f32 %v389_v31, %v234_v32  ;;  %v460_v34 = vpop.f32.mrb[1].mxu1 }
 0x1d4   :  { %v237_v35 = vpop.f32.mrb[2].mxu1 }
 0x1d5   :  { %v240_v36 = vmax.f32 %v235_v33, 0.0  ;;  %v461_v37 = vpop.f32.mrb[3].mxu1 }
 0x1d7   :  { %v241_v38 = vpack.c.bf16 %v240_v36, %v240_v36 }
 0x1d9   :  { %479 = vmatmul.mubr.bf16.vlgmr.msra.gmra.mrb[4].mxu0 %v241_v38 }
 0x2ac   :  { %v347_v40 = vpop.f32.mrb[4].mxu0 }
 0x2ad   :  { %v348_v41 = vadd.f32 %v398_v39, %v347_v40  ;;  %v480_v42 = vpop.f32.mrb[5].mxu0 }
 0x2ae   :  { %v350_v43 = vpop.f32.mrb[6].mxu0 }
 0x2af   :  { %v481_v44 = vpop.f32.mrb[7].mxu0  ;;  %v354_v45 = vsel %vm353_vm2, %v348_v41, -inf }
 0x2b0   :  { %355 = vmax.xlane.f32.xlu0 %v354_v45 }
 0x33d   :  { %v356_v46 = vpop.xlane.xlu0 %355 }
 0x33e   :  { %v357_v47 = vsub.f32 %v348_v41, %v356_v46 }
 0x340   :  { %v358_v48 = vmul.f32 1.442695, %v357_v47 }
 0x342   :  { %510 = vpow2.f32 %v358_v48 }
 0x34c   :  { %v511_v49 = vpop.eup %510 }
 0x34d   :  { %v360_v50 = vsel %vm353_vm2, %v511_v49, 0.0 }
 0x34e   :  { %361 = vadd.xlane.f32.xlu0 %v360_v50 }
 0x3db   :  { %v362_v51 = vpop.xlane.xlu0 %361 }
 0x3dc   :  { %512 = vrcp.f32 %v362_v51 }
 0x3e6   :  { %v513_v52 = vpop.eup %512 }
 0x3e7   :  { %v364_v53 = vmul.f32 %v513_v52, %v511_v49 }
 0x3e9   :  { %365 = vst.msk [vmem:[#allocation5] sm:$0xff] %vm353_vm2, %v364_v53 }
 0x3ea   :  { %370 = vsyncadd [#allocation4], 96  ;;  %s567_s4 = smov [#allocation5]  }
 0x3eb   :  { %s371_s5 = sshll.u32 %s567_s4, 4  ;;  %s372_s5 = int_to_ptr.vmem [resolvable:$true] %s371_s5 }
 0x3ec   :  { %s536_s6 = scalar_lea.vmem %s372_s5, 32  ;;  %s540_s26 = scalar_lea.vmem %s372_s5, 128 }
 0x3ed   :  { %p537_p8 = scmp.ne.s32.totalorder %s372_s5, %s536_s6  ;;  %p541_p9 = scmp.lt.s32.totalorder %s372_s5, %s372_s5 }
 0x3ee   :  { %p542_p10 = scmp.lt.s32.totalorder %s540_s26, %s536_s6 }
 0x3f0   :  { %p543_p11 = por %p542_p10, %p541_p9 }
 0x3f2   :  { %p544_p12 = pnand %p543_p11, %p537_p8 }
 0x3f4   :  { %547 = shalt.err (!%p544_p12)
}
 0x3f5   :  { %s548_s29 = scalar_lea.hbm %s730_s7, 32 }
 0x3f6   :  { %p549_p13 = scmp.ne.s32.totalorder %s730_s7, %s548_s29  ;;  %p552_p0 = scmp.lt.u32.totalorder %s548_s29, %s730_s7 }
 0x3f8   :  { %p554_p1 = pnand %p552_p0, %p549_p13 }
 0x3fa   :  { %557 = shalt.err (!%p554_p1)
}
 0x3fb   :  { %s568_s11 = smov 32   ;;  %s569_s12 = smov 2  }
 0x3fc   :  { %377 = dma.vmem_to_hbm [thread:$0]  %s372_s5, 32, %s730_s7, [#allocation4], %s568_s11, %s568_s11, %s569_s12  }
 0x3fd   :  { %560 = dma.done.wait [#allocation4], 128  }
 0x3fe   :  { %561 = vsyncadd [#allocation4], 4294967168 }
 0x3ff   :  { %381 = vsyncpa [#allocation3], 1 }
 0x400   :  { %382 = vsyncpa [#allocation4], 1 }

</bundles_post_ra>
